<compile_context>
chip_gen: v6e
topology: v6e:2x2x1
jax: 0.10.0
libtpu: 0.0.40
codegen_flags: <defaults>
</compile_context>

<pallas_src>
import functools

import jax
import jax.numpy as jnp
from jax.experimental import pallas as pl
from jax.experimental.pallas import tpu as pltpu


# --------------------------------------------------------------------------
# Kernels
# --------------------------------------------------------------------------

def _ce_partial_kernel_rows(logits_ref, target_ref, out_ref, *,
                            ignore_index, n_rows, block_n, f32_reduce):
    """Row-major (block_n, C) tile -> (1, 128) partial [loss_sum, count]."""
    i = pl.program_id(0)

    logits = logits_ref[...]                                  # (bn, C) native dtype
    if f32_reduce:
        logits = logits.astype(jnp.float32)
    tgt = target_ref[...]                                     # (bn, 1) int32
    bn, c = logits.shape

    # max / one-hot gather are exact in the native dtype (bf16 on v6e/v7x).
    row_max = jnp.max(logits, axis=-1, keepdims=True)                       # (bn, 1)
    shifted = logits.astype(jnp.float32) - row_max.astype(jnp.float32)
    lse = (jnp.log(jnp.sum(jnp.exp(shifted), axis=-1, keepdims=True))
           + row_max.astype(jnp.float32))                                   # (bn, 1)

    # (1, C) iota broadcast against (bn, 1) targets — no (bn, C) iota tile.
    cls_ids = jax.lax.broadcasted_iota(jnp.int32, (1, c), 1)                # (1, C)
    onehot = cls_ids == tgt                                                 # (bn, C)
    tgt_logit = jnp.sum(jnp.where(onehot, logits, 0),
                        axis=-1, keepdims=True).astype(jnp.float32)         # (bn, 1)

    # Mask ignore_index rows and padded rows of the last block.
    row_ids = i * block_n + jax.lax.broadcasted_iota(jnp.int32, (bn, 1), 0)
    valid = (tgt != ignore_index) & (row_ids < n_rows)

    per_row = jnp.where(valid, lse - tgt_logit, 0.0)
    loss_sum = jnp.sum(per_row)
    count = jnp.sum(valid.astype(jnp.float32))

    lane = jax.lax.broadcasted_iota(jnp.int32, (1, 128), 1)
    out_ref[...] = jnp.where(lane == 0, loss_sum,
                             jnp.where(lane == 1, count, 0.0))


def _ce_partial_kernel_cf(logits_ref, target_ref, out_ref, *,
                          ignore_index, s_total, block_s, f32_reduce):
    """Channel-first (1, C, block_s) tile (class on sublanes, spatial on lanes)."""
    j = pl.program_id(1)

    logits = logits_ref[...][0]                               # (C, bs) native dtype
    if f32_reduce:
        logits = logits.astype(jnp.float32)
    tgt = target_ref[...]                                     # (1, bs) int32
    c, bs = logits.shape

    col_max = jnp.max(logits, axis=0, keepdims=True)                        # (1, bs)
    shifted = logits.astype(jnp.float32) - col_max.astype(jnp.float32)
    lse = (jnp.log(jnp.sum(jnp.exp(shifted), axis=0, keepdims=True))
           + col_max.astype(jnp.float32))                                   # (1, bs)

    cls_ids = jax.lax.broadcasted_iota(jnp.int32, (c, 1), 0)                # (C, 1)
    onehot = cls_ids == tgt                                                 # (C, bs)
    tgt_logit = jnp.sum(jnp.where(onehot, logits, 0),
                        axis=0, keepdims=True).astype(jnp.float32)           # (1, bs)

    col_ids = j * block_s + jax.lax.broadcasted_iota(jnp.int32, (1, bs), 1)
    valid = (tgt != ignore_index) & (col_ids < s_total)

    per_pos = jnp.where(valid, lse - tgt_logit, 0.0)
    loss_sum = jnp.sum(per_pos)
    count = jnp.sum(valid.astype(jnp.float32))

    lane = jax.lax.broadcasted_iota(jnp.int32, (1, 128), 1)
    out_ref[...] = jnp.where(lane == 0, loss_sum,
                             jnp.where(lane == 1, count, 0.0))


# --------------------------------------------------------------------------
# Wrappers
# --------------------------------------------------------------------------

_VMEM_LIMIT = 48 * 1024 * 1024          # <= 64 MiB physical on v7x, fine on v5e/v6e
_BUF_BYTES = 2 * 1024 * 1024            # per native-dtype logits buffer (x2 dbl-buf)


def _needs_f32_reduce(dtype):
    """Cast whole tile to f32 if input is f32 already, or chip has no bf16 VALU."""
    if dtype == jnp.float32:
        return True
    try:
        kind = jax.devices()[0].device_kind.lower()
    except Exception:
        kind = ""
    return any(tag in kind for tag in ("v2", "v3", "v4", "v5"))


def _finalize(partials):
    loss_sum = jnp.sum(partials[:, 0])
    count = jnp.sum(partials[:, 1])
    # count == 0 -> 0/0 = NaN, matching PyTorch CrossEntropyLoss.
    return loss_sum / count


def _loss_rows(output, target, ignore_index, f32_reduce):
    n, c = output.shape
    target2d = target.astype(jnp.int32).reshape(n, 1)

    bytes_per_row = max(c * output.dtype.itemsize, 1)
    block_n = _BUF_BYTES // bytes_per_row
    block_n = max(8, (block_n // 8) * 8)
    if n <= block_n:
        block_n = n                       # full-dim block is always legal
    num_blocks = pl.cdiv(n, block_n)

    kernel = functools.partial(_ce_partial_kernel_rows,
                               ignore_index=ignore_index, n_rows=n,
                               block_n=block_n, f32_reduce=f32_reduce)

    cost = pl.CostEstimate(
        flops=5 * n * c,
        transcendentals=n * c + n,
        bytes_accessed=n * c * output.dtype.itemsize + n * 4 + num_blocks * 128 * 4)

    partials = pl.pallas_call(
        kernel,
        out_shape=jax.ShapeDtypeStruct((num_blocks, 128), jnp.float32),
        grid=(num_blocks,),
        in_specs=[
            pl.BlockSpec((block_n, c), lambda i: (i, 0)),     # logits (native dtype)
            pl.BlockSpec((block_n, 1), lambda i: (i, 0)),     # targets
        ],
        out_specs=pl.BlockSpec((1, 128), lambda i: (i, 0)),
        compiler_params=pltpu.CompilerParams(
            dimension_semantics=("parallel",),
            vmem_limit_bytes=_VMEM_LIMIT),
        cost_estimate=cost,
    )(output, target2d)

    return _finalize(partials)


def _loss_channel_first(output, target, ignore_index, f32_reduce):
    """(N, C, d1, ...) handled in its native layout: class on sublanes."""
    n, c = output.shape[0], output.shape[1]
    s = 1
    for d in output.shape[2:]:
        s *= d
    logits = output.reshape(n, c, s)                 # trailing-dim collapse, no copy
    target2d = target.astype(jnp.int32).reshape(n, s)

    # TODO(synk): for very large C (e.g. 100k-class heads) add a class-axis
    # grid dim with an online-logsumexp accumulator so VMEM stays bounded.
    bytes_per_col = max(c * output.dtype.itemsize, 1)
    block_s = _BUF_BYTES // bytes_per_col
    block_s = max(128, (block_s // 128) * 128)
    if s <= block_s:
        block_s = s
    num_s_blocks = pl.cdiv(s, block_s)

    kernel = functools.partial(_ce_partial_kernel_cf,
                               ignore_index=ignore_index, s_total=s,
                               block_s=block_s, f32_reduce=f32_reduce)

    cost = pl.CostEstimate(
        flops=5 * n * s * c,
        transcendentals=n * s * c + n * s,
        bytes_accessed=(n * s * c * output.dtype.itemsize + n * s * 4
                        + n * num_s_blocks * 128 * 4))

    partials = pl.pallas_call(
        kernel,
        out_shape=jax.ShapeDtypeStruct((n * num_s_blocks, 128), jnp.float32),
        grid=(n, num_s_blocks),
        in_specs=[
            pl.BlockSpec((1, c, block_s), lambda i, j: (i, 0, j)),   # logits tile
            pl.BlockSpec((1, block_s), lambda i, j: (i, j)),         # targets tile
        ],
        out_specs=pl.BlockSpec((1, 128),
                               lambda i, j: (i * num_s_blocks + j, 0)),
        compiler_params=pltpu.CompilerParams(
            dimension_semantics=("parallel", "parallel"),
            vmem_limit_bytes=_VMEM_LIMIT),
        cost_estimate=cost,
    )(logits, target2d)

    return _finalize(partials)


def single_task_loss(output, target, *, ignore_index=-100):
    """CrossEntropyLoss(ignore_index=...)(output, target) — mean reduction."""
    output = jnp.asarray(output)
    target = jnp.asarray(target)
    f32_reduce = _needs_f32_reduce(output.dtype)

    if output.ndim > 2:
        return _loss_channel_first(output, target, ignore_index, f32_reduce)
    if output.ndim == 1:
        output = output[None, :]
        target = target.reshape(1)
    return _loss_rows(output, target, ignore_index, f32_reduce)


# --------------------------------------------------------------------------
# Reference + self-test
# --------------------------------------------------------------------------

def _reference_2d(logits, target, ignore_index=-100):
    logits = logits.astype(jnp.float32)
    lse = jax.nn.logsumexp(logits, axis=-1)
    tgt_clipped = jnp.where(target == ignore_index, 0, target)
    tgt_logit = jnp.take_along_axis(logits, tgt_clipped[:, None], axis=-1)[:, 0]
    valid = target != ignore_index
    per_row = jnp.where(valid, lse - tgt_logit, 0.0)
    return jnp.sum(per_row) / jnp.sum(valid.astype(jnp.float32))


if __name__ == "__main__":
    IGNORE_INDEX = -100

    key = jax.random.PRNGKey(0)
    k1, k2, k3, k4 = jax.random.split(key, 4)

    # ---- 2D (N, C) case: N=64 rows, C=32 classes, f32 ----
    N, C = 64, 32
    logits = jax.random.normal(k1, (N, C), dtype=jnp.float32)
    target = jax.random.randint(k2, (N,), 0, C, dtype=jnp.int32)
    target = target.at[0].set(IGNORE_INDEX)
    target = target.at[5].set(IGNORE_INDEX)

    loss = jax.block_until_ready(
        single_task_loss(logits, target, ignore_index=IGNORE_INDEX))
    ref = _reference_2d(logits, target, IGNORE_INDEX)
    assert jnp.allclose(loss, ref, rtol=1e-5, atol=1e-5), (loss, ref)

    # ---- bf16 input fed straight to the kernel (no wrapper cast) ----
    logits_bf16 = logits.astype(jnp.bfloat16)
    loss_bf16 = jax.block_until_ready(
        single_task_loss(logits_bf16, target, ignore_index=IGNORE_INDEX))
    ref_bf16 = _reference_2d(logits_bf16.astype(jnp.float32), target, IGNORE_INDEX)
    assert jnp.allclose(loss_bf16, ref_bf16, rtol=2e-2, atol=2e-2), (loss_bf16, ref_bf16)

    # ---- 4D segmentation-style case (B, C, H, W): no wrapper transpose ----
    B, C4, H, W = 2, 4, 8, 8
    logits4 = jax.random.normal(k3, (B, C4, H, W), dtype=jnp.float32)
    target4 = jax.random.randint(k4, (B, H, W), 0, C4, dtype=jnp.int32)
    target4 = target4.at[0, 0, 0].set(IGNORE_INDEX)
    target4 = target4.at[1, 3, 5].set(IGNORE_INDEX)

    loss4 = jax.block_until_ready(
        single_task_loss(logits4, target4, ignore_index=IGNORE_INDEX))
    ref_flat_logits = jnp.transpose(logits4, (0, 2, 3, 1)).reshape(-1, C4)
    ref_flat_target = target4.reshape(-1)
    ref4 = _reference_2d(ref_flat_logits, ref_flat_target, IGNORE_INDEX)
    assert jnp.allclose(loss4, ref4, rtol=1e-5, atol=1e-5), (loss4, ref4)

    print("KERNEL_OK")
</pallas_src>

<mosaic_0001>
module attributes {stable_mosaic.version = 11 : i64} {
  func.func @_ce_partial_kernel_rows(%arg0: i32, %arg1: memref<64x32xf32, #tpu.memory_space<vmem>>, %arg2: memref<64x1xi32, #tpu.memory_space<vmem>>, %arg3: memref<1x128xf32, #tpu.memory_space<vmem>>) attributes {dimension_semantics = [#tpu.dimension_semantics<parallel>], iteration_bounds = array<i64: 1>, scalar_prefetch = 0 : i64, scratch_operands = 0 : i64, tpu.core_type = #tpu.core_type<tc>, window_params = [{transform_indices = @transform_0, window_bounds = array<i64: 64, 32>}, {transform_indices = @transform_1, window_bounds = array<i64: 64, 1>}, {transform_indices = @transform_2, window_bounds = array<i64: 1, 128>}]} {
    %c0 = arith.constant 0 : index
    %c0_0 = arith.constant 0 : index
    %0 = vector.load %arg1[%c0, %c0_0] : memref<64x32xf32, #tpu.memory_space<vmem>>, vector<64x32xf32>
    %c0_1 = arith.constant 0 : index
    %c0_2 = arith.constant 0 : index
    %1 = vector.load %arg2[%c0_1, %c0_2] : memref<64x1xi32, #tpu.memory_space<vmem>>, vector<64x1xi32>
    %cst = arith.constant dense<0xFF800000> : vector<64xf32>
    %2 = vector.multi_reduction <maximumf>, %0, %cst [1] : vector<64x32xf32> to vector<64xf32>
    %3 = vector.shape_cast %2 : vector<64xf32> to vector<64x1xf32>
    %4 = vector.broadcast %3 : vector<64x1xf32> to vector<64x32xf32>
    %5 = arith.subf %0, %4 : vector<64x32xf32>
    %6 = math.exp %5 : vector<64x32xf32>
    %cst_3 = arith.constant dense<0.000000e+00> : vector<64xf32>
    %7 = vector.multi_reduction <add>, %6, %cst_3 [1] : vector<64x32xf32> to vector<64xf32>
    %8 = vector.shape_cast %7 : vector<64xf32> to vector<64x1xf32>
    %9 = math.log %8 : vector<64x1xf32>
    %10 = arith.addf %9, %3 : vector<64x1xf32>
    %11 = tpu.iota {dimensions = array<i32: 1>} : vector<1x32xi32>
    %12 = vector.broadcast %11 : vector<1x32xi32> to vector<64x32xi32>
    %13 = vector.broadcast %1 : vector<64x1xi32> to vector<64x32xi32>
    %14 = arith.cmpi eq, %12, %13 : vector<64x32xi32>
    %c0_i32 = arith.constant 0 : i32
    %15 = arith.sitofp %c0_i32 : i32 to f32
    %16 = vector.broadcast %15 : f32 to vector<64x32xf32>
    %17 = arith.select %14, %0, %16 : vector<64x32xi1>, vector<64x32xf32>
    %cst_4 = arith.constant dense<0.000000e+00> : vector<64xf32>
    %18 = vector.multi_reduction <add>, %17, %cst_4 [1] : vector<64x32xf32> to vector<64xf32>
    %19 = vector.shape_cast %18 : vector<64xf32> to vector<64x1xf32>
    %c64_i32 = arith.constant 64 : i32
    %20 = arith.muli %arg0, %c64_i32 : i32
    %21 = tpu.iota {dimensions = array<i32: 0>} : vector<64x1xi32>
    %22 = vector.broadcast %20 : i32 to vector<64x1xi32>
    %23 = arith.addi %22, %21 : vector<64x1xi32>
    %c-100_i32 = arith.constant -100 : i32
    %24 = vector.broadcast %c-100_i32 : i32 to vector<64x1xi32>
    %25 = arith.cmpi ne, %1, %24 : vector<64x1xi32>
    %c64_i32_5 = arith.constant 64 : i32
    %26 = vector.broadcast %c64_i32_5 : i32 to vector<64x1xi32>
    %27 = arith.cmpi slt, %23, %26 : vector<64x1xi32>
    %28 = arith.andi %25, %27 : vector<64x1xi1>
    %29 = arith.subf %10, %19 : vector<64x1xf32>
    %cst_6 = arith.constant 0.000000e+00 : f32
    %30 = vector.broadcast %cst_6 : f32 to vector<64x1xf32>
    %31 = arith.select %28, %29, %30 : vector<64x1xi1>, vector<64x1xf32>
    %32 = vector.shape_cast %31 : vector<64x1xf32> to vector<1x64x1xf32>
    %cst_7 = arith.constant dense<0.000000e+00> : vector<1xf32>
    %33 = vector.multi_reduction <add>, %32, %cst_7 [1, 2] : vector<1x64x1xf32> to vector<1xf32>
    %34 = vector.shape_cast %33 : vector<1xf32> to vector<1x1x1xf32>
    %35 = vector.extract %34[0, 0, 0] : f32 from vector<1x1x1xf32>
    %36 = arith.extui %28 : vector<64x1xi1> to vector<64x1xi32>
    %37 = arith.sitofp %36 : vector<64x1xi32> to vector<64x1xf32>
    %38 = vector.shape_cast %37 : vector<64x1xf32> to vector<1x64x1xf32>
    %cst_8 = arith.constant dense<0.000000e+00> : vector<1xf32>
    %39 = vector.multi_reduction <add>, %38, %cst_8 [1, 2] : vector<1x64x1xf32> to vector<1xf32>
    %40 = vector.shape_cast %39 : vector<1xf32> to vector<1x1x1xf32>
    %41 = vector.extract %40[0, 0, 0] : f32 from vector<1x1x1xf32>
    %42 = tpu.iota {dimensions = array<i32: 1>} : vector<1x128xi32>
    %c0_i32_9 = arith.constant 0 : i32
    %43 = vector.broadcast %c0_i32_9 : i32 to vector<1x128xi32>
    %44 = arith.cmpi eq, %42, %43 : vector<1x128xi32>
    %c1_i32 = arith.constant 1 : i32
    %45 = vector.broadcast %c1_i32 : i32 to vector<1x128xi32>
    %46 = arith.cmpi eq, %42, %45 : vector<1x128xi32>
    %cst_10 = arith.constant 0.000000e+00 : f32
    %47 = vector.broadcast %41 : f32 to vector<1x128xf32>
    %48 = vector.broadcast %cst_10 : f32 to vector<1x128xf32>
    %49 = arith.select %46, %47, %48 : vector<1x128xi1>, vector<1x128xf32>
    %50 = vector.broadcast %35 : f32 to vector<1x128xf32>
    %51 = arith.select %44, %50, %49 : vector<1x128xi1>, vector<1x128xf32>
    %c0_11 = arith.constant 0 : index
    %c0_12 = arith.constant 0 : index
    %52 = vector.load %arg3[%c0_11, %c0_12] : memref<1x128xf32, #tpu.memory_space<vmem>>, vector<1x128xf32>
    tpu.vector_store %arg3[%c0_11, %c0_12], %51 {strides = array<i32>} : memref<1x128xf32, #tpu.memory_space<vmem>>, vector<1x128xf32>,
    return
  }
  func.func @transform_0(%arg0: i32) -> (i32, i32) {
    %c0_i32 = arith.constant 0 : i32
    %c0_i32_0 = arith.constant 0 : i32
    return %arg0, %c0_i32 : i32, i32
  }
  func.func @transform_1(%arg0: i32) -> (i32, i32) {
    %c0_i32 = arith.constant 0 : i32
    %c0_i32_0 = arith.constant 0 : i32
    return %arg0, %c0_i32 : i32, i32
  }
  func.func @transform_2(%arg0: i32) -> (i32, i32) {
    %c0_i32 = arith.constant 0 : i32
    %c0_i32_0 = arith.constant 0 : i32
    return %arg0, %c0_i32 : i32, i32
  }
}

</mosaic_0001>

<bundles_post_ra>
// kernel: tpu_custom_call.1
= control target key start
LH: loop header
LB: loop body
LE: loop exit
PB: predicated region body
PF: predicated region fallthrough
CT: control target
= control target key end

     0   :  { %vm28_vm0 = vcmask 261120   ;;  %v407_v6 = vmov 0   ;;  %s664_s0 = inlined_call_operand.vmem [shape: f32[64,32], index: 0, kind: input, shape index: {}]   ;;  %s665_s1 = inlined_call_operand.vmem [shape: s32[64,1], index: 1, kind: input, shape index: {}]   ;;  %s666_s2 = inlined_call_operand.hbm [shape: f32[1,128], index: 2, kind: output, shape index: {}]  }
   0x1   :  { %v428_v0 = vld [vmem:[%s664_s0 + $0x10] sm:$0xff]  ;;  %v433_v1 = vld [vmem:[%s664_s0] sm:$0xff]  ;;  %v438_v2 = vld [vmem:[%s664_s0 + $0x18] sm:$0xff]  ;;  %352 = vset.pattern.permute.xlu1 %v407_v6  ;;  %351 = vset.pattern.permute.xlu0 %v407_v6 }
   0x2   :  { %v35_v3 = vsel %vm28_vm0, %v428_v0, -inf  ;;  %v29_v4 = vsel %vm28_vm0, %v433_v1, -inf  ;;  %v447_v5 = vld [vmem:[%s664_s0 + $0x8] sm:$0xff]  ;;  %v38_v7 = vsel %vm28_vm0, %v438_v2, -inf  ;;  %v461_v10 = vld [vmem:[%s664_s0 + $0x20] sm:$0xff] }
   0x3   :  { %36 = vmax.xlane.f32.xlu1 %v35_v3  ;;  %30 = vmax.xlane.f32.xlu0 %v29_v4  ;;  %v32_v8 = vsel %vm28_vm0, %v447_v5, -inf  ;;  %v456_v9 = vld [vmem:[%s664_s0 + $0x28] sm:$0xff] }
   0x7   :  { %39 = vmax.xlane.f32.xlu1 %v38_v7  ;;  %33 = vmax.xlane.f32.xlu0 %v32_v8 }
   0x8   :  { %7 = vsyncpa [#allocation3], 0  ;;  %v44_v11 = vsel %vm28_vm0, %v456_v9, -inf  ;;  %v41_v12 = vsel %vm28_vm0, %v461_v10, -inf  ;;  %v470_v13 = vld [vmem:[%s664_s0 + $0x38] sm:$0xff]  ;;  %v475_v14 = vld [vmem:[%s664_s0 + $0x30] sm:$0xff]  ;;  %v125_v54 = vlaneseq }
   0x9   :  { %v50_v15 = vsel %vm28_vm0, %v470_v13, -inf  ;;  %v47_v16 = vsel %vm28_vm0, %v475_v14, -inf  ;;  %v484_v17 = vld [vmem:[%s665_s1 + $0x8] sm:$0xff]  ;;  %v490_v18 = vld [vmem:[%s665_s1 + $0x10] sm:$0xff]  ;;  %v495_v19 = vld [vmem:[%s665_s1] sm:$0xff]  ;;  %vm250_vm10 = vcmask 7168  }
   0xa   :  { %v501_v20 = vld [vmem:[%s665_s1 + $0x18] sm:$0xff]  ;;  %v508_v21 = vld [vmem:[%s665_s1 + $0x20] sm:$0xff]  ;;  %v514_v22 = vld [vmem:[%s665_s1 + $0x28] sm:$0xff]  ;;  %v564_v61 = vand.u32 127, %v125_v54  ;;  %vm211_vm6 = vcmp.ne.s32.totalorder %v484_v17, 4294967196  ;;  %vm210_vm7 = vcmp.ne.s32.totalorder %v495_v19, 4294967196 }
   0xb   :  { %45 = vmax.xlane.f32.xlu1 %v44_v11  ;;  %42 = vmax.xlane.f32.xlu0 %v41_v12  ;;  %v520_v23 = vld [vmem:[%s665_s1 + $0x30] sm:$0xff]  ;;  %v526_v24 = vld [vmem:[%s665_s1 + $0x38] sm:$0xff]  ;;  %vm212_vm11 = vcmp.ne.s32.totalorder %v490_v18, 4294967196  ;;  %vm213_vm13 = vcmp.ne.s32.totalorder %v501_v20, 4294967196  ;;  %vm214_vm14 = vcmp.ne.s32.totalorder %v508_v21, 4294967196  ;;  %vm215_vm15 = vcmp.ne.s32.totalorder %v514_v22, 4294967196 }
   0xc   :  { %s409_s12 = smov [#allocation2]  }
   0xd   :  { %s328_s13 = sshll.u32 %s409_s12, 4  ;;  %s329_s13 = int_to_ptr.vmem [resolvable:$true] %s328_s13 }
   0xe   :  { %s385_s15 = scalar_lea.vmem %s329_s13, 16  ;;  %s389_s16 = scalar_lea.vmem %s329_s13, 32 }
   0xf   :  { %51 = vmax.xlane.f32.xlu1 %v50_v15  ;;  %48 = vmax.xlane.f32.xlu0 %v47_v16  ;;  %p386_p0 = scmp.ne.s32.totalorder %s329_s13, %s385_s15  ;;  %p390_p1 = scmp.lt.s32.totalorder %s329_s13, %s329_s13 }
  0x10   :  { %p391_p2 = scmp.lt.s32.totalorder %s389_s16, %s385_s15 }
  0x12   :  { %p392_p3 = por %p391_p2, %p390_p1 }
  0x14   :  { %p393_p4 = pnand %p392_p3, %p386_p0 }
  0x20   :  { %131 = vperm.xlu1 %352, %v484_v17  }
  0x24   :  { %134 = vperm.xlu1 %352, %v490_v18  }
  0x25   :  { %128 = vperm.xlu0 %351, %v495_v19  }
  0x28   :  { %137 = vperm.xlu1 %352, %v501_v20  }
  0x2c   :  { %140 = vperm.xlu1 %352, %v508_v21  }
  0x30   :  { %143 = vperm.xlu1 %352, %v514_v22  }
  0x34   :  { %146 = vperm.xlu1 %352, %v520_v23  }
  0x38   :  { %149 = vperm.xlu1 %352, %v526_v24  }
  0x8c   :  { %v529_v25 = vpop.xlane.xlu1 %36  ;;  %v531_v26 = vpop.xlane.xlu0 %30 }
  0x8d   :  { %v53_v27 = vsub.f32 %v433_v1, %v531_v26  ;;  %v55_v29 = vsub.f32 %v428_v0, %v529_v25 }
  0x8f   :  { %v61_v28 = vmul.f32 1.442695, %v53_v27  ;;  %v65_v36 = vmul.f32 1.442695, %v55_v29 }
  0x90   :  { %v537_v30 = vpop.xlane.xlu1 %39  ;;  %v539_v31 = vpop.xlane.xlu0 %33 }
  0x91   :  { %v56_v32 = vsub.f32 %v438_v2, %v537_v30  ;;  %v54_v33 = vsub.f32 %v447_v5, %v539_v31  ;;  %353 = vpow2.f32 %v61_v28 }
  0x93   :  { %v67_v34 = vmul.f32 1.442695, %v56_v32  ;;  %v63_v35 = vmul.f32 1.442695, %v54_v33 }
  0x94   :  { %v545_v37 = vpop.xlane.xlu1 %45  ;;  %v547_v38 = vpop.xlane.xlu0 %42 }
  0x95   :  { %355 = vpow2.f32 %v67_v34  ;;  %v58_v39 = vsub.f32 %v456_v9, %v545_v37  ;;  %v57_v40 = vsub.f32 %v461_v10, %v547_v38 }
  0x96   :  { %357 = vpow2.f32 %v63_v35 }
  0x97   :  { %v71_v41 = vmul.f32 1.442695, %v58_v39  ;;  %v69_v42 = vmul.f32 1.442695, %v57_v40  ;;  %359 = vpow2.f32 %v65_v36 }
  0x98   :  { %v553_v43 = vpop.xlane.xlu1 %51  ;;  %v555_v44 = vpop.xlane.xlu0 %48 }
  0x99   :  { %361 = vpow2.f32 %v71_v41  ;;  %v60_v45 = vsub.f32 %v470_v13, %v553_v43  ;;  %v59_v46 = vsub.f32 %v475_v14, %v555_v44 }
  0x9a   :  { %363 = vpow2.f32 %v69_v42 }
  0x9b   :  { %v75_v47 = vmul.f32 1.442695, %v60_v45  ;;  %v73_v48 = vmul.f32 1.442695, %v59_v46 }
  0x9c   :  { %v132_v49 = vpop.permute.xlu1 %131 }
  0x9d   :  { %365 = vpow2.f32 %v75_v47  ;;  %vm152_vm1 = vcmp.eq.s32.totalorder %v564_v61, %v132_v49 }
  0x9e   :  { %367 = vpow2.f32 %v73_v48  ;;  %v354_v50 = vpop.eup %353  ;;  %v160_v16 = vsel %vm152_vm1, %v447_v5, 0.0  ;;  %vm216_vm1 = vcmp.ne.s32.totalorder %v520_v23, 4294967196 }
  0x9f   :  { %v77_v52 = vsel %vm28_vm0, %v354_v50, 0.0  ;;  %v170_v32 = vsel %vm28_vm0, %v160_v16, 0.0 }
  0xa0   :  { %v135_v51 = vpop.permute.xlu1 %134  ;;  %78 = vadd.xlane.f32.xlu1 %v77_v52  ;;  %v129_v6 = vpop.permute.xlu0 %128 }
  0xa1   :  { %vm151_vm2 = vcmp.eq.s32.totalorder %v564_v61, %v129_v6  ;;  %vm153_vm4 = vcmp.eq.s32.totalorder %v564_v61, %v135_v51 }
  0xa2   :  { %v356_v53 = vpop.eup %355  ;;  %v159_v28 = vsel %vm151_vm2, %v433_v1, 0.0  ;;  %v161_v36 = vsel %vm153_vm4, %v428_v0, 0.0  ;;  %vm316_vm2 = vcmp.eq.s32.totalorder %v564_v61, 1 }
  0xa3   :  { %v358_v55 = vpop.eup %357  ;;  %v86_v56 = vsel %vm28_vm0, %v356_v53, 0.0  ;;  %v167_v34 = vsel %vm28_vm0, %v159_v28, 0.0  ;;  %v173_v42 = vsel %vm28_vm0, %v161_v36, 0.0 }
  0xa4   :  { %v138_v57 = vpop.permute.xlu1 %137  ;;  %v80_v58 = vsel %vm28_vm0, %v358_v55, 0.0  ;;  %v360_v59 = vpop.eup %359  ;;  %87 = vadd.xlane.f32.xlu1 %v86_v56 }
  0xa5   :  { %81 = vadd.xlane.f32.xlu0 %v80_v58  ;;  %v83_v4 = vsel %vm28_vm0, %v360_v59, 0.0  ;;  %vm154_vm3 = vcmp.eq.s32.totalorder %v564_v61, %v138_v57 }
  0xa6   :  { %v362_v60 = vpop.eup %361  ;;  %v162_v33 = vsel %vm154_vm3, %v438_v2, 0.0  ;;  %v408_v2 = vmov 0.0   ;;  %vm315_vm3 = vcmp.eq.s32.totalorder %v564_v61, 0 }
  0xa7   :  { %v364_v62 = vpop.eup %363  ;;  %v92_v63 = vsel %vm28_vm0, %v362_v60, 0.0  ;;  %v176_v35 = vsel %vm28_vm0, %v162_v33, 0.0  ;;  %v337_v39 = vsel %vm211_vm6, 1.0, %v408_v2  ;;  %v336_v40 = vsel %vm210_vm7, 1.0, %v408_v2 }
  0xa8   :  { %v141_v3 = vpop.permute.xlu1 %140  ;;  %93 = vadd.xlane.f32.xlu1 %v92_v63  ;;  %v89_v8 = vsel %vm28_vm0, %v364_v62, 0.0  ;;  %v292_v45 = vsel %vm250_vm10, %v337_v39, 0.0  ;;  %v291_v46 = vsel %vm250_vm10, %v336_v40, 0.0  ;;  %v338_v47 = vsel %vm212_vm11, 1.0, %v408_v2 }
  0xa9   :  { %84 = vadd.xlane.f32.xlu0 %v83_v4  ;;  %vm155_vm8 = vcmp.eq.s32.totalorder %v564_v61, %v141_v3  ;;  %v294_v50 = vsel %vm250_vm10, %v338_v47, 0.0  ;;  %v339_v51 = vsel %vm213_vm13, 1.0, %v408_v2  ;;  %v340_v53 = vsel %vm214_vm14, 1.0, %v408_v2 }
  0xaa   :  { %v366_v7 = vpop.eup %365  ;;  %v296_v55 = vsel %vm250_vm10, %v339_v51, 0.0  ;;  %v298_v56 = vsel %vm250_vm10, %v340_v53, 0.0  ;;  %v342_v59 = vsel %vm216_vm1, 1.0, %v408_v2 }
  0xab   :  { %v368_v11 = vpop.eup %367  ;;  %v98_v12 = vsel %vm28_vm0, %v366_v7, 0.0  ;;  %v302_v63 = vsel %vm250_vm10, %v342_v59, 0.0 }
  0xac   :  { %v144_v15 = vpop.permute.xlu1 %143  ;;  %99 = vadd.xlane.f32.xlu1 %v98_v12  ;;  %v95_v27 = vsel %vm28_vm0, %v368_v11, 0.0 }
  0xad   :  { %90 = vadd.xlane.f32.xlu0 %v89_v8  ;;  %vm156_vm5 = vcmp.eq.s32.totalorder %v564_v61, %v144_v15 }
  0xae   :  { %v164_v1 = vsel %vm156_vm5, %v456_v9, 0.0  ;;  %v163_v9 = vsel %vm155_vm8, %v461_v10, 0.0  ;;  %v293_v10 = vadd.f32 %v292_v45, %v291_v46 }
  0xaf   :  { %v182_v41 = vsel %vm28_vm0, %v164_v1, 0.0  ;;  %v179_v49 = vsel %vm28_vm0, %v163_v9, 0.0 }
  0xb0   :  { %v147_v29 = vpop.permute.xlu1 %146  ;;  %171 = vadd.xlane.f32.xlu1 %v170_v32  ;;  %v295_v54 = vadd.f32 %v294_v50, %v293_v10 }
  0xb1   :  { %96 = vadd.xlane.f32.xlu0 %v95_v27  ;;  %vm157_vm12 = vcmp.eq.s32.totalorder %v564_v61, %v147_v29 }
  0xb2   :  { %v297_v57 = vadd.f32 %v296_v55, %v295_v54 }
  0xb4   :  { %v150_v5 = vpop.permute.xlu1 %149  ;;  %177 = vadd.xlane.f32.xlu1 %v176_v35  ;;  %v299_v60 = vadd.f32 %v298_v56, %v297_v57 }
  0xb5   :  { %168 = vadd.xlane.f32.xlu0 %v167_v34  ;;  %vm158_vm9 = vcmp.eq.s32.totalorder %v564_v61, %v150_v5 }
  0xb6   :  { %v166_v0 = vsel %vm158_vm9, %v470_v13, 0.0  ;;  %v165_v13 = vsel %vm157_vm12, %v475_v14, 0.0  ;;  %v341_v14 = vsel %vm215_vm15, 1.0, %v408_v2 }
  0xb7   :  { %v188_v48 = vsel %vm28_vm0, %v166_v0, 0.0  ;;  %v185_v52 = vsel %vm28_vm0, %v165_v13, 0.0  ;;  %v300_v58 = vsel %vm250_vm10, %v341_v14, 0.0  ;;  %vm217_vm0 = vcmp.ne.s32.totalorder %v526_v24, 4294967196 }
  0xb8   :  { %183 = vadd.xlane.f32.xlu1 %v182_v41  ;;  %v301_v62 = vadd.f32 %v300_v58, %v299_v60  ;;  %v343_v3 = vsel %vm217_vm0, 1.0, %v408_v2 }
  0xb9   :  { %174 = vadd.xlane.f32.xlu0 %v173_v42  ;;  %v304_v6 = vsel %vm250_vm10, %v343_v3, 0.0 }
  0xba   :  { %v303_v4 = vadd.f32 %v302_v63, %v301_v62 }
  0xbc   :  { %189 = vadd.xlane.f32.xlu1 %v188_v48  ;;  %v305_v7 = vadd.f32 %v304_v6, %v303_v4 }
  0xbd   :  { %180 = vadd.xlane.f32.xlu0 %v179_v49 }
  0xc0   :  { %306 = vadd.xlane.f32.xlu1 %v305_v7 }
  0xc1   :  { %186 = vadd.xlane.f32.xlu0 %v185_v52 }
 0x129   :  { %v79_v8 = vpop.xlane.xlu1 %78 }
 0x12a   :  { %369 = vlog2.f32 %v79_v8 }
 0x12d   :  { %v88_v11 = vpop.xlane.xlu1 %87 }
 0x12e   :  { %v82_v12 = vpop.xlane.xlu0 %81  ;;  %371 = vlog2.f32 %v88_v11 }
 0x12f   :  { %373 = vlog2.f32 %v82_v12 }
 0x131   :  { %v94_v15 = vpop.xlane.xlu1 %93 }
 0x132   :  { %v85_v16 = vpop.xlane.xlu0 %84  ;;  %375 = vlog2.f32 %v94_v15 }
 0x133   :  { %377 = vlog2.f32 %v85_v16 }
 0x135   :  { %v100_v27 = vpop.xlane.xlu1 %99 }
 0x136   :  { %v91_v28 = vpop.xlane.xlu0 %90  ;;  %379 = vlog2.f32 %v100_v27 }
 0x137   :  { %v370_v29 = vpop.eup %369  ;;  %381 = vlog2.f32 %v91_v28 }
 0x138   :  { %v102_v32 = vmul.f32 0.6931472, %v370_v29 }
 0x139   :  { %v172_v33 = vpop.xlane.xlu1 %171 }
 0x13a   :  { %v97_v34 = vpop.xlane.xlu0 %96  ;;  %v117_v2 = vadd.f32 %v102_v32, %v531_v26 }
 0x13b   :  { %383 = vlog2.f32 %v97_v34  ;;  %v372_v5 = vpop.eup %371 }
 0x13c   :  { %v374_v35 = vpop.eup %373  ;;  %v108_v1 = vmul.f32 0.6931472, %v372_v5 }
 0x13d   :  { %v104_v36 = vmul.f32 0.6931472, %v374_v35  ;;  %v178_v41 = vpop.xlane.xlu1 %177 }
 0x13e   :  { %v169_v39 = vpop.xlane.xlu0 %168  ;;  %v120_v40 = vadd.f32 %v108_v1, %v537_v30 }
 0x13f   :  { %v376_v42 = vpop.eup %375  ;;  %v118_v0 = vadd.f32 %v104_v36, %v539_v31  ;;  %v234_v9 = vsub.f32 %v117_v2, %v169_v39 }
 0x140   :  { %v378_v45 = vpop.eup %377  ;;  %v112_v46 = vmul.f32 0.6931472, %v376_v42  ;;  %v237_v13 = vsub.f32 %v120_v40, %v178_v41 }
 0x141   :  { %v106_v47 = vmul.f32 0.6931472, %v378_v45  ;;  %v235_v48 = vsub.f32 %v118_v0, %v172_v33  ;;  %v242_v30 = vsel %vm210_vm7, %v234_v9, 0.0  ;;  %v184_v54 = vpop.xlane.xlu1 %183 }
 0x142   :  { %v175_v49 = vpop.xlane.xlu0 %174  ;;  %v122_v10 = vadd.f32 %v112_v46, %v545_v37  ;;  %v245_v37 = vsel %vm213_vm13, %v237_v13, 0.0  ;;  %v251_v57 = vsel %vm250_vm10, %v242_v30, 0.0 }
 0x143   :  { %v380_v50 = vpop.eup %379  ;;  %v243_v26 = vsel %vm211_vm6, %v235_v48, 0.0  ;;  %v119_v51 = vadd.f32 %v106_v47, %v529_v25  ;;  %v256_v20 = vsel %vm250_vm10, %v245_v37, 0.0 }
 0x144   :  { %v382_v52 = vpop.eup %381  ;;  %v116_v31 = vmul.f32 0.6931472, %v380_v50  ;;  %v252_v53 = vsel %vm250_vm10, %v243_v26, 0.0  ;;  %v239_v17 = vsub.f32 %v122_v10, %v184_v54 }
 0x145   :  { %v110_v55 = vmul.f32 0.6931472, %v382_v52  ;;  %v236_v14 = vsub.f32 %v119_v51, %v175_v49  ;;  %v253_v59 = vadd.f32 %v252_v53, %v251_v57  ;;  %v190_v6 = vpop.xlane.xlu1 %189 }
 0x146   :  { %v181_v56 = vpop.xlane.xlu0 %180  ;;  %v124_v25 = vadd.f32 %v116_v31, %v553_v43  ;;  %v247_v8 = vsel %vm215_vm15, %v239_v17, 0.0 }
 0x147   :  { %v244_v19 = vsel %vm212_vm11, %v236_v14, 0.0  ;;  %v121_v60 = vadd.f32 %v110_v55, %v547_v38  ;;  %v260_v27 = vsel %vm250_vm10, %v247_v8, 0.0 }
 0x148   :  { %v384_v58 = vpop.eup %383  ;;  %v254_v63 = vsel %vm250_vm10, %v244_v19, 0.0  ;;  %v241_v11 = vsub.f32 %v124_v25, %v190_v6 }
 0x149   :  { %v114_v62 = vmul.f32 0.6931472, %v384_v58  ;;  %v255_v3 = vadd.f32 %v254_v63, %v253_v59  ;;  %v238_v4 = vsub.f32 %v121_v60, %v181_v56  ;;  %v307_v34 = vpop.xlane.xlu1 %306 }
 0x14a   :  { %v187_v12 = vpop.xlane.xlu0 %186  ;;  %v308_v5 = vrot.slane %v307_v34, 4 }
 0x14b   :  { %v123_v7 = vadd.f32 %v114_v62, %v555_v44  ;;  %v257_v18 = vadd.f32 %v256_v20, %v255_v3  ;;  %v246_v43 = vsel %vm214_vm14, %v238_v4, 0.0  ;;  %v249_v44 = vsel %vm217_vm0, %v241_v11, 0.0 }
 0x14c   :  { %v258_v38 = vsel %vm250_vm10, %v246_v43, 0.0  ;;  %v264_v21 = vsel %vm250_vm10, %v249_v44, 0.0  ;;  %v309_v35 = vadd.f32 %v308_v5, %v307_v34 }
 0x14d   :  { %v240_v15 = vsub.f32 %v123_v7, %v187_v12  ;;  %v259_v16 = vadd.f32 %v258_v38, %v257_v18 }
 0x14e   :  { %v310_v1 = vrot.slane %v309_v35, 2 }
 0x14f   :  { %v248_v28 = vsel %vm216_vm1, %v240_v15, 0.0  ;;  %v261_v29 = vadd.f32 %v260_v27, %v259_v16 }
 0x150   :  { %v262_v22 = vsel %vm250_vm10, %v248_v28, 0.0  ;;  %v311_v23 = vadd.f32 %v310_v1, %v309_v35 }
 0x151   :  { %v263_v32 = vadd.f32 %v262_v22, %v261_v29 }
 0x152   :  { %v312_v24 = vrot.slane %v311_v23, 1 }
 0x153   :  { %v265_v33 = vadd.f32 %v264_v21, %v263_v32 }
 0x154   :  { %v313_v9 = vadd.f32 %v312_v24, %v311_v23 }
 0x155   :  { %266 = vadd.xlane.f32.xlu0 %v265_v33 }
 0x1de   :  { %v267_v36 = vpop.xlane.xlu0 %266 }
 0x1df   :  { %v268_v2 = vrot.slane %v267_v36, 4 }
 0x1e1   :  { %v269_v39 = vadd.f32 %v268_v2, %v267_v36 }
 0x1e3   :  { %v270_v40 = vrot.slane %v269_v39, 2 }
 0x1e5   :  { %v271_v41 = vadd.f32 %v270_v40, %v269_v39 }
 0x1e7   :  { %v272_v42 = vrot.slane %v271_v41, 1 }
 0x1e9   :  { %v273_v0 = vadd.f32 %v272_v42, %v271_v41 }
 0x1eb   :  { %344 = vpush %v273_v0 }
 0x1ec   :  { %346 = vpush %v313_v9 }
 0x21c   :  { %s345_s1 = spop %344 }
 0x21d   :  { %v319_v45 = vstv %s345_s1  ;;  %s347_s14 = spop %346 }
 0x21e   :  { %v317_v46 = vstv %s347_s14 }
 0x21f   :  { %v318_v47 = vsel %vm316_vm2, %v317_v46, 0.0 }
 0x220   :  { %v320_v48 = vsel %vm315_vm3, %v319_v45, %v318_v47 }
 0x221   :  { %321 = vst [vmem:[#allocation2] sm:$0x1] %v320_v48 }
 0x222   :  { %396 = shalt.err (!%p393_p4)
}
 0x223   :  { %331 = dma.vmem_to_hbm [thread:$0]  %s329_s13, 16, %s666_s2, [#allocation3]  }
 0x224   :  { %405 = dma.done.wait [#allocation3], 16  }
 0x225   :  { %406 = vsyncadd [#allocation3], 4294967280 }
 0x226   :  { %335 = vsyncpa [#allocation3], 1 }

</bundles_post_ra>
